<compile_context>
chip_gen: v7x
topology: tpu7x:2x2x1
jax: 0.10.0
libtpu: 0.0.40
codegen_flags: <defaults>
</compile_context>

<pallas_src>
import jax
import jax.numpy as jnp
from jax.experimental import pallas as pl
from jax.experimental.pallas import tpu as pltpu

STUDENT_TEMP = 0.1
TEACHER_TEMP = 0.04
CENTER_MOMENTUM = 0.9  # center EMA bookkeeping only; not part of forward()


def _dino_loss_kernel(s_ref, t_ref, out_ref, tsum_ref, trow_ref):
    """One (batch_tile, student_crop) pair per grid step.

    s_ref:    (1, B_tile, D)   raw student logits for crop i, batch tile bt
    t_ref:    (NT, B_tile, D)  teacher probs (VMEM-resident across student crops)
    out_ref:  (1, B_tile, 1)   per-row partial: sum_j sum_d t_j * log_softmax_i
    tsum_ref: (B_tile, D) f32  scratch: sum over teacher crops
    trow_ref: (B_tile, 1) f32  scratch: sum over D of tsum (== NT analytically)
    """
    i = pl.program_id(1)

    # Teacher-crop sum computed once per batch tile; the inner (student) grid
    # axis is "arbitrary" so the scratch is carried across student crops.
    @pl.when(i == 0)
    def _():
        tsum_ref[...] = jnp.sum(t_ref[...].astype(jnp.float32), axis=0)
        trow_ref[...] = jnp.sum(tsum_ref[...], axis=-1, keepdims=True)

    s = s_ref[0].astype(jnp.float32) * jnp.float32(1.0 / STUDENT_TEMP)   # (B_tile, D)
    # Numerically-stable log-softmax pieces along the lane (feature) axis.
    m = jnp.max(s, axis=-1, keepdims=True)                               # (B_tile, 1)
    lse = jnp.log(jnp.sum(jnp.exp(s - m), axis=-1, keepdims=True))       # (B_tile, 1)

    # sum_d t * (s - m - lse) = sum_d t*s - (sum_d t) * (m + lse)
    dot = jnp.sum(tsum_ref[...] * s, axis=-1, keepdims=True)             # (B_tile, 1)
    out_ref[0] = dot - trow_ref[...] * (m + lse)


def _choose_b_tile(b, d, nt, s_bytes, t_bytes, vmem_budget_bytes=20 << 20):
    """Batch-tile size: multiple of 8, divides B, total VMEM within budget."""
    if b <= 8:
        return b
    # Per batch row in VMEM: student block (2 bufs) + teacher block (NT crops,
    # 2 bufs) + f32 teacher-sum scratch (+ tiny rowsum).
    row_bytes = d * (2 * s_bytes + 2 * nt * t_bytes + 4) + 4
    bt = (vmem_budget_bytes // max(1, row_bytes)) // 8 * 8
    bt = int(max(8, min(bt, b)))
    while b % bt != 0 and bt > 8:
        bt -= 8
    if b % bt != 0:
        bt = b
    return bt


def dino_loss_forward(student_stack, teacher_stack, *, b_tile=None):
    """student_stack: (NS, B, D) raw student logits.
    teacher_stack:   (NT, B, D) teacher probabilities (already softmaxed/centered).
    Returns scalar f32 total loss (same semantics as DINOLoss.forward: all
    NS x NT pairs, each term normalized by batch mean).
    """
    ns, b, d = student_stack.shape
    nt, bt_, dt_ = teacher_stack.shape
    assert (bt_, dt_) == (b, d), (teacher_stack.shape, student_stack.shape)

    if b_tile is None:
        b_tile = _choose_b_tile(
            b, d, nt, student_stack.dtype.itemsize, teacher_stack.dtype.itemsize
        )
    assert b % b_tile == 0, (b, b_tile)
    n_bt = b // b_tile

    per_row = pl.pallas_call(
        _dino_loss_kernel,
        out_shape=jax.ShapeDtypeStruct((ns, b, 1), jnp.float32),
        grid_spec=pltpu.PrefetchScalarGridSpec(
            num_scalar_prefetch=0,
            # batch-tile axis OUTER, student-crop axis INNER so the teacher
            # block (index_map ignores i) stays resident in VMEM across
            # student crops and its crop-sum is computed once per batch tile.
            grid=(n_bt, ns),
            in_specs=[
                pl.BlockSpec((1, b_tile, d), lambda bt, i: (i, bt, 0)),
                pl.BlockSpec((nt, b_tile, d), lambda bt, i: (0, bt, 0)),
            ],
            out_specs=pl.BlockSpec((1, b_tile, 1), lambda bt, i: (i, bt, 0)),
            scratch_shapes=[
                pltpu.VMEM((b_tile, d), jnp.float32),
                pltpu.VMEM((b_tile, 1), jnp.float32),
            ],
        ),
        compiler_params=pltpu.CompilerParams(
            # batch tiles are independent (megacore-splittable on v7x); the
            # student axis carries the teacher-sum scratch -> "arbitrary".
            dimension_semantics=("parallel", "arbitrary"),
            vmem_limit_bytes=32 * 1024 * 1024,
        ),
    )(student_stack, teacher_stack)

    # total_loss = sum_i sum_j ( -mean_b sum_d t_j * lsm_i )
    return -jnp.sum(per_row) / jnp.float32(b)


def softmax_center_teacher(teacher_output, center, teacher_temp):
    """Plain-JAX glue replicating DINOLoss.softmax_center_teacher (no_grad path)."""
    logits = (teacher_output - center) / teacher_temp
    return jax.nn.softmax(logits, axis=-1)


def _reference_forward(student_list, teacher_list):
    total = jnp.float32(0.0)
    for s in student_list:
        lsm = jax.nn.log_softmax(s.astype(jnp.float32) / STUDENT_TEMP, axis=-1)
        for t in teacher_list:
            loss = jnp.sum(t.astype(jnp.float32) * lsm, axis=-1)
            total = total - jnp.mean(loss)
    return total


if __name__ == "__main__":
    key = jax.random.PRNGKey(0)
    B, D = 16, 256        # batch, out_dim (D lane-dense: multiple of 128)
    NS, NT = 4, 2         # number of student / teacher crops

    k1, k2 = jax.random.split(key)
    student_stack = jax.random.normal(k1, (NS, B, D), dtype=jnp.float32)
    teacher_raw = jax.random.normal(k2, (NT, B, D), dtype=jnp.float32)

    # Deterministic buffer init as in __init__: center = zeros(1, out_dim)
    center = jnp.zeros((1, D), dtype=jnp.float32)

    # Teacher side: softmax_center_teacher (plain-JAX glue; hot path is the kernel)
    teacher_stack = jnp.stack(
        [softmax_center_teacher(teacher_raw[j], center, TEACHER_TEMP) for j in range(NT)]
    )

    # b_tile=8 exercises the batch-tiling + per-tile teacher-sum path (2 tiles).
    loss = dino_loss_forward(student_stack, teacher_stack, b_tile=8)
    loss = jax.block_until_ready(loss)

    ref = _reference_forward(list(student_stack), list(teacher_stack))
    assert jnp.allclose(loss, ref, rtol=1e-4, atol=1e-4), (loss, ref)

    # TODO(synk): sinkhorn_knopp_teacher / distributed center EMA update
    # (dist.all_reduce) are training-time utilities outside forward(); not kernels.

    print("KERNEL_OK")
</pallas_src>

<mosaic_0001>
module attributes {stable_mosaic.version = 11 : i64} {
  func.func @_dino_loss_kernel(%arg0: i32, %arg1: i32, %arg2: memref<1x8x256xf32, #tpu.memory_space<vmem>>, %arg3: memref<2x8x256xf32, #tpu.memory_space<vmem>>, %arg4: memref<1x8x1xf32, #tpu.memory_space<vmem>>, %arg5: memref<8x256xf32, #tpu.memory_space<vmem>>, %arg6: memref<8x1xf32, #tpu.memory_space<vmem>>) attributes {dimension_semantics = [#tpu.dimension_semantics<parallel>, #tpu.dimension_semantics<arbitrary>], iteration_bounds = array<i64: 2, 4>, scalar_prefetch = 0 : i64, scratch_operands = 2 : i64, tpu.core_type = #tpu.core_type<tc>, window_params = [{transform_indices = @transform_0, window_bounds = array<i64: 1, 8, 256>}, {transform_indices = @transform_1, window_bounds = array<i64: 2, 8, 256>}, {transform_indices = @transform_2, window_bounds = array<i64: 1, 8, 1>}]} {
    %c0_i32 = arith.constant 0 : i32
    %0 = arith.cmpi eq, %arg1, %c0_i32 : i32
    %1 = arith.extui %0 : i1 to i32
    %c0_i32_0 = arith.constant 0 : i32
    %2 = arith.cmpi ne, %1, %c0_i32_0 : i32
    scf.if %2 {
      %c0_13 = arith.constant 0 : index
      %c0_14 = arith.constant 0 : index
      %c0_15 = arith.constant 0 : index
      %26 = vector.load %arg3[%c0_13, %c0_14, %c0_15] : memref<2x8x256xf32, #tpu.memory_space<vmem>>, vector<2x8x256xf32>
      %cst_16 = arith.constant dense<0.000000e+00> : vector<8x256xf32>
      %27 = vector.multi_reduction <add>, %26, %cst_16 [0] : vector<2x8x256xf32> to vector<8x256xf32>
      %c0_17 = arith.constant 0 : index
      %c0_18 = arith.constant 0 : index
      %28 = vector.load %arg5[%c0_17, %c0_18] : memref<8x256xf32, #tpu.memory_space<vmem>>, vector<8x256xf32>
      tpu.vector_store %arg5[%c0_17, %c0_18], %27 {strides = array<i32>} : memref<8x256xf32, #tpu.memory_space<vmem>>, vector<8x256xf32>,
      %c0_19 = arith.constant 0 : index
      %c0_20 = arith.constant 0 : index
      %29 = vector.load %arg5[%c0_19, %c0_20] : memref<8x256xf32, #tpu.memory_space<vmem>>, vector<8x256xf32>
      %cst_21 = arith.constant dense<0.000000e+00> : vector<8xf32>
      %30 = vector.multi_reduction <add>, %29, %cst_21 [1] : vector<8x256xf32> to vector<8xf32>
      %31 = vector.shape_cast %30 : vector<8xf32> to vector<8x1xf32>
      %c0_22 = arith.constant 0 : index
      %c0_23 = arith.constant 0 : index
      %32 = vector.load %arg6[%c0_22, %c0_23] : memref<8x1xf32, #tpu.memory_space<vmem>>, vector<8x1xf32>
      tpu.vector_store %arg6[%c0_22, %c0_23], %31 {strides = array<i32>} : memref<8x1xf32, #tpu.memory_space<vmem>>, vector<8x1xf32>,
    } else {
    }
    %c0 = arith.constant 0 : index
    %c0_1 = arith.constant 0 : index
    %c0_2 = arith.constant 0 : index
    %3 = vector.load %arg2[%c0, %c0_1, %c0_2] : memref<1x8x256xf32, #tpu.memory_space<vmem>>, vector<1x8x256xf32>
    %4 = vector.shape_cast %3 : vector<1x8x256xf32> to vector<8x256xf32>
    %cst = arith.constant 1.000000e+01 : f32
    %5 = vector.broadcast %cst : f32 to vector<8x256xf32>
    %6 = arith.mulf %4, %5 : vector<8x256xf32>
    %cst_3 = arith.constant dense<0xFF800000> : vector<8xf32>
    %7 = vector.multi_reduction <maximumf>, %6, %cst_3 [1] : vector<8x256xf32> to vector<8xf32>
    %8 = vector.shape_cast %7 : vector<8xf32> to vector<8x1xf32>
    %9 = vector.broadcast %8 : vector<8x1xf32> to vector<8x256xf32>
    %10 = arith.subf %6, %9 : vector<8x256xf32>
    %11 = math.exp %10 : vector<8x256xf32>
    %cst_4 = arith.constant dense<0.000000e+00> : vector<8xf32>
    %12 = vector.multi_reduction <add>, %11, %cst_4 [1] : vector<8x256xf32> to vector<8xf32>
    %13 = vector.shape_cast %12 : vector<8xf32> to vector<8x1xf32>
    %14 = math.log %13 : vector<8x1xf32>
    %c0_5 = arith.constant 0 : index
    %c0_6 = arith.constant 0 : index
    %15 = vector.load %arg5[%c0_5, %c0_6] : memref<8x256xf32, #tpu.memory_space<vmem>>, vector<8x256xf32>
    %16 = arith.mulf %15, %6 : vector<8x256xf32>
    %cst_7 = arith.constant dense<0.000000e+00> : vector<8xf32>
    %17 = vector.multi_reduction <add>, %16, %cst_7 [1] : vector<8x256xf32> to vector<8xf32>
    %18 = vector.shape_cast %17 : vector<8xf32> to vector<8x1xf32>
    %c0_8 = arith.constant 0 : index
    %c0_9 = arith.constant 0 : index
    %19 = vector.load %arg6[%c0_8, %c0_9] : memref<8x1xf32, #tpu.memory_space<vmem>>, vector<8x1xf32>
    %20 = arith.addf %8, %14 : vector<8x1xf32>
    %21 = arith.mulf %19, %20 : vector<8x1xf32>
    %22 = arith.subf %18, %21 : vector<8x1xf32>
    %c0_10 = arith.constant 0 : index
    %c0_11 = arith.constant 0 : index
    %c0_12 = arith.constant 0 : index
    %23 = vector.load %arg4[%c0_10, %c0_11, %c0_12] : memref<1x8x1xf32, #tpu.memory_space<vmem>>, vector<1x8x1xf32>
    %24 = vector.shape_cast %23 : vector<1x8x1xf32> to vector<8x1xf32>
    %25 = vector.shape_cast %22 : vector<8x1xf32> to vector<1x8x1xf32>
    tpu.vector_store %arg4[%c0_10, %c0_11, %c0_12], %25 {strides = array<i32>} : memref<1x8x1xf32, #tpu.memory_space<vmem>>, vector<1x8x1xf32>,
    return
  }
  func.func @transform_0(%arg0: i32, %arg1: i32) -> (i32, i32, i32) {
    %c0_i32 = arith.constant 0 : i32
    %c0_i32_0 = arith.constant 0 : i32
    return %arg1, %arg0, %c0_i32 : i32, i32, i32
  }
  func.func @transform_1(%arg0: i32, %arg1: i32) -> (i32, i32, i32) {
    %c0_i32 = arith.constant 0 : i32
    %c0_i32_0 = arith.constant 0 : i32
    %c0_i32_1 = arith.constant 0 : i32
    return %c0_i32, %arg0, %c0_i32_0 : i32, i32, i32
  }
  func.func @transform_2(%arg0: i32, %arg1: i32) -> (i32, i32, i32) {
    %c0_i32 = arith.constant 0 : i32
    %c0_i32_0 = arith.constant 0 : i32
    return %arg1, %arg0, %c0_i32 : i32, i32, i32
  }
}

</mosaic_0001>

<bundles_post_ra>
// kernel: tpu_custom_call.1
= control target key start
LH: loop header
LB: loop body
LE: loop exit
PB: predicated region body
PF: predicated region fallthrough
CT: control target
= control target key end

     0   :  { %7 = vsyncpa [#allocation5], 0  ;;  %s970_s0 = inlined_call_operand.hbm [shape: f32[4,16,256], index: 0, kind: input, shape index: {}]   ;;  %s971_s1 = inlined_call_operand.hbm [shape: f32[2,16,256], index: 1, kind: input, shape index: {}]   ;;  %s972_s2 = inlined_call_operand.vmem [shape: f32[4,16,1], index: 2, kind: output, shape index: {}]  }
   0x1   :  { %9 = vsyncpa [#allocation5 + $0x1], 0 }
   0x2   :  { %10 = vsyncpa [#allocation7], 0 }
   0x3   :  { %12 = vsyncpa [#allocation7 + $0x1], 0  ;;  %s699_s9 = smov 0   ;;  %s701_s10 = smov 0  }
   0x4   :  { %s703_s11 = smov 0   ;;  %s705_s12 = smov 0  }
   0x5   :  { %s707_s13 = smov 0   ;;  %s709_s14 = smov 0  }
   0x6   :  { %s711_s15 = smov 0   ;;  %s713_s16 = smov 0  }
   0x7   :  { %s715_s17 = smov 0   ;;  %s717_s18 = smov 0  }
   0x8   :  { %s719_s19 = smov 0  }
   0x9 LB: > { %s394_s20 = sadd.s32 4294967295, %s677_s19   ;;  %s27_s21 = sadd.s32 1, %s669_s17  ;;  %s677_s19 = sphi %s719_s19, %s18_s19   ;;  %s673_s18 = sphi %s717_s18, %s999_s18   ;;  %s669_s17 = sphi %s715_s17, %s998_s17   ;;  %s665_s16 = sphi %s713_s16, %s997_s16   ;;  %s661_s15 = sphi %s711_s15, %s996_s15   ;;  %s657_s14 = sphi %s709_s14, %s995_s14   ;;  %s653_s13 = sphi %s707_s13, %s994_s13   ;;  %s649_s12 = sphi %s705_s12, %s993_s12   ;;  %s645_s11 = sphi %s703_s11, %s992_s11   ;;  %s641_s10 = sphi %s701_s10, %s991_s10   ;;  %s637_s9 = sphi %s699_s9, %s990_s9  }
   0xa   : > { %p28_p0 = scmp.ge.s32.totalorder %s27_s21, 4  ;;  %s30_s22 = sadd.s32 1, %s673_s18 }
   0xb   : > { %s39_s23 = sadd.s32 1, %s657_s14  ;;  %p46_p1 = scmp.ne.s32.totalorder %s657_s14, %s653_s13 }
   0xc   : > { %s1001_s21 = smov (%p28_p0, %s27_s21), 0  ;;  %s1003_s22 = smov (!%p28_p0, %s30_s22), %s673_s18 }
   0xd   : > { %s34_s24 = ssub.s32 %s669_s17, %s1001_s21  ;;  %p47_p2 = scmp.eq.s32.totalorder %s677_s19, 0 }
   0xe   : > { %p32_p3 = scmp.ge.s32.totalorder %s1003_s22, 2  ;;  %p52_p4 = scmp.ne.s32.totalorder %s653_s13, %s649_s12 }
   0xf   : > { %p767_p5 = por %p47_p2, %p46_p1  ;;  %p771_p6 = scmp.eq.s32.totalorder %s394_s20, 0 }
  0x10   : > { %s1005_s22 = smov (%p32_p3, %s1003_s22), 0  ;;  %s65_s28 = sadd.s32 1, %s645_s11 }
  0x11   : > { %978 = sst [smem:[#allocation10_spill]] %s1005_s22  ;;  %p779_p7 = por %p771_p6, %p52_p4 }
  0x12   : > { %s35_s29 = ssub.s32 %s673_s18, %s1005_s22  ;;  %p72_p8 = scmp.ne.s32.totalorder %s645_s11, %s641_s10 }
  0x13   : > { %s979_s27 = scalar_select %p779_p7, 1, 0 }
  0x14   : > { %s36_s30 = sor.u32 %s35_s29, %s34_s24  ;;  %p63_p9 = scmp.eq.s32.totalorder %s35_s29, 0 }
  0x15   : > { %p37_p10 = scmp.eq.s32.totalorder %s36_s30, 0  ;;  %p790_p11 = por %p72_p8, %p47_p2 }
  0x16   : > { %s795_s4 = scalar_select %p63_p9, %s645_s11, %s65_s28  }
  0x17   : > { %s798_s5 = scalar_select %p37_p10, %s657_s14, %s39_s23  }
  0x18   : > { %p78_p12 = scmp.ne.s32.totalorder %s641_s10, %s637_s9  ;;  %p425_p13 = scmp.lt.s32.totalorder %s677_s19, 8 }
  0x19   : > { %s130_s6 = sand.u32 1, %s657_s14   ;;  %s399_s12 = sshll.u32 %s673_s18, 1 }
  0x1a   : > { %p806_p0 = por %p78_p12, %p771_p6  ;;  %s398_s8 = sshll.u32 %s130_s6, 4 }
  0x1b   : > { %s400_s20 = sshll.u32 %s669_s17, 2  ;;  %s134_s28 = scalar_lea.vmem [#allocation4], %s398_s8 }
  0x1c   : > { %s981_s7 = scalar_select %p806_p0, 1, 0 }
  0x1d   : > { %s140_s24 = sadd.s32 %s400_s20, %s399_s12  ;;  %s144_s29 = sshll.u32 %s134_s28, 4  ;;  %s812_s29 = int_to_ptr.vmem [resolvable:$true] %s144_s29 }
  0x1e   : > { %s401_s30 = sshll.u32 %s140_s24, 7  ;;  %p823_p1 = pnand %p425_p13, %p767_p5 }
  0x1f   : > { %s817_s9 = scalar_lea.hbm %s970_s0, %s401_s30  ;;  %p831_p2 = pnand %p425_p13, %p790_p11 }
  0x20   : > { %s131_s22 = scalar_lea.sflag [#allocation5], %s130_s6  ;;  %s523_s25 = scalar_lea.hbm %s817_s9, 256 }
  0x21   : > { %p524_p6 = scmp.ne.s32.totalorder %s817_s9, %s523_s25  ;;  %p525_p8 = pneg %p823_p1 }
  0x22   : > { %s528_s20 = scalar_lea.hbm %s970_s0, 2048  ;;  %p529_p10 = scmp.lt.u32.totalorder %s817_s9, %s970_s0 }
  0x23   : > { %p526_p5 = pnand %p525_p8, %p524_p6  ;;  %p530_p11 = scmp.lt.u32.totalorder %s528_s20, %s523_s25 }
  0x24   : > { %p532_p13 = scmp.lt.u32.totalorder %s523_s25, %s817_s9 }
  0x25   : > { %p527_p9 = pneg %p526_p5  ;;  %p531_p12 = por %p530_p11, %p529_p10 }
  0x27   : > { %p533_p3 = por %p532_p13, %p531_p12 }
  0x29   : > { %p534_p4 = pnand %p533_p3, %p527_p9 }
  0x2b   : > { %537 = shalt.err (!%p534_p4)
}
  0x2c   : > { %s538_s6 = scalar_lea.vmem %s812_s29, 256  ;;  %s679_s30 = smov [#allocation4]  }
  0x2d   : > { %p539_p6 = scmp.ne.s32.totalorder %s812_s29, %s538_s6  ;;  %s543_s23 = sshll.u32 %s679_s30, 4  ;;  %s544_s23 = int_to_ptr.vmem [resolvable:$false] %s543_s23 }
  0x2e   : > { %s545_s12 = scalar_lea.vmem %s544_s23, 512  ;;  %p546_p7 = scmp.lt.s32.totalorder %s812_s29, %s544_s23 }
  0x2f   : > { %p541_p5 = pnand %p539_p6, %p525_p8  ;;  %p547_p10 = scmp.lt.s32.totalorder %s545_s12, %s538_s6 }
  0x31   : > { %p542_p0 = pneg %p541_p5  ;;  %p548_p11 = por %p547_p10, %p546_p7 }
  0x33   : > { %p549_p12 = pnand %p548_p11, %p542_p0 }
  0x35   : > { %552 = shalt.err (!%p549_p12)
}
  0x36   : > { %421 = dma.hbm_to_vmem [thread:$0]  (!%p823_p1), %s817_s9, 256, %s812_s29, %s131_s22  }
  0x37   : > { %p984_p3 = scmp.lt.s32.totalorder %s677_s19, 9  ;;  %p985_p4 = scmp.ge.s32.totalorder %s677_s19, 1 }
  0x38   : > { %s151_s3 = sand.u32 1, %s645_s11   ;;  %s413_s20 = sshll.u32 %s673_s18, 8 }
  0x39   : > { %p866_p8 = pnand %p985_p4, %p984_p3  ;;  %s402_s24 = sshll.u32 %s151_s3, 5 }
  0x3a   : > { %s875_s6 = scalar_lea.hbm %s971_s1, %s413_s20  ;;  %s155_s30 = scalar_lea.vmem [#allocation6], %s402_s24 }
  0x3b   : > { %s162_s29 = sshll.u32 %s155_s30, 4  ;;  %s879_s9 = scalar_lea.sflag [#allocation7], %s151_s3  ;;  %s877_s29 = int_to_ptr.vmem [resolvable:$true] %s162_s29 }
  0x3c   : > { %s553_s22 = scalar_lea.hbm %s875_s6, 512  ;;  %p555_p0 = pneg %p831_p2 }
  0x3d   : > { %p554_p7 = scmp.ne.s32.totalorder %s875_s6, %s553_s22  ;;  %s558_s20 = scalar_lea.hbm %s971_s1, 1024 }
  0x3e   : > { %p559_p13 = scmp.lt.u32.totalorder %s875_s6, %s971_s1  ;;  %p560_p6 = scmp.lt.u32.totalorder %s558_s20, %s553_s22 }
  0x3f   : > { %p556_p1 = pnand %p555_p0, %p554_p7  ;;  %p562_p10 = scmp.lt.u32.totalorder %s553_s22, %s875_s6 }
  0x40   : > { %p561_p5 = por %p560_p6, %p559_p13 }
  0x41   : > { %p557_p9 = pneg %p556_p1 }
  0x42   : > { %p563_p11 = por %p562_p10, %p561_p5 }
  0x44   : > { %p564_p12 = pnand %p563_p11, %p557_p9 }
  0x46   : > { %567 = shalt.err (!%p564_p12)
}
  0x47   : > { %s568_s3 = scalar_lea.vmem %s877_s29, 512  ;;  %s680_s24 = smov [#allocation6]  }
  0x48   : > { %p569_p3 = scmp.ne.s32.totalorder %s877_s29, %s568_s3  ;;  %s573_s30 = sshll.u32 %s680_s24, 4  ;;  %s574_s30 = int_to_ptr.vmem [resolvable:$false] %s573_s30 }
  0x49   : > { %s575_s23 = scalar_lea.vmem %s574_s30, 1024  ;;  %p576_p1 = scmp.lt.s32.totalorder %s877_s29, %s574_s30 }
  0x4a   : > { %p571_p4 = pnand %p569_p3, %p555_p0  ;;  %p577_p13 = scmp.lt.s32.totalorder %s575_s23, %s568_s3 }
  0x4c   : > { %p572_p7 = pneg %p571_p4  ;;  %p578_p6 = por %p577_p13, %p576_p1 }
  0x4e   : > { %p579_p5 = pnand %p578_p6, %p572_p7 }
  0x50   : > { %582 = shalt.err (!%p579_p5)
}
  0x51   : > { %s681_s22 = smov 512   ;;  %s682_s12 = smov 256  }
  0x52   : > { %s683_s20 = smov 16   ;;  %174 = sbr.rel (%p866_p8) target bundleno = 574 (0x23e), region = 28 }
  0x53   : > { %424 = dma.hbm_to_vmem [thread:$0]  (!%p831_p2), %s875_s6, 512, %s877_s29, %s879_s9, %s681_s22, %s682_s12, %s683_s20  }
  0x54   : > { %s176_s28 = sand.u32 (!%p866_p8), 1, %s653_s13   ;;  %p987_p0 = scmp.ne.s32.totalorder (!%p866_p8), %s979_s27, 0 }
  0x55   : > { %s910_s26 = sshll.u32 (!%p866_p8), %s176_s28, 4  ;;  %s177_s3 = scalar_lea.sflag (!%p866_p8), [#allocation5], %s176_s28 }
  0x56   : > { %s180_s24 = scalar_lea.vmem (!%p866_p8), [#allocation4], %s910_s26 }
  0x59   : > { %628 = dma.done.wait (%p987_p0), %s177_s3, 256  }
  0x5a   : > { %630 = vsyncadd (%p987_p0), %s177_s3, 4294967040  ;;  %s185_s8 = sand.u32 1, %s641_s10   ;;  %p988_p2 = scmp.ne.s32.totalorder %s981_s7, 0 }
  0x5b   : > { %s407_s6 = sshll.u32 %s185_s8, 5  ;;  %s186_s29 = scalar_lea.sflag [#allocation7], %s185_s8 }
  0x5c   : > { %s189_s25 = scalar_lea.vmem [#allocation6], %s407_s6 }
  0x5d   : > { %632 = dma.done.wait (%p988_p2), %s186_s29, 512  }
  0x5e   : > { %634 = vsyncadd (%p988_p2), %s186_s29, 4294966784  ;;  %p218_p8 = scmp.lt.s32.totalorder %s661_s15, 3  ;;  %p220_p9 = scmp.lt.s32.totalorder %s665_s16, 1 }
  0x5f   : > { %p410_p10 = scmp.ne.s32.totalorder %s661_s15, 0 }
  0x60   : > { %s219_s9 = scalar_select %p218_p8, %s661_s15, 3 }
  0x61   : > { %s1007_s16 = smov (!%p220_p9, %s665_s16), 1  ;;  %229 = sbr.rel (%p410_p10) target bundleno = 247 (0xf7), region = 40 }
  0x62   : > { %s408_s27 = sshll.u32 %s219_s9, 1  ;;  %v230_v0 = vld [vmem:[%s189_s25] sm:$0xff] (!%p410_p10)  ;;  %v231_v1 = vld [vmem:[%s189_s25 + $0x8] sm:$0xff] (!%p410_p10)  ;;  %v232_v2 = vld [vmem:[%s189_s25 + $0x10] sm:$0xff] (!%p410_p10)  ;;  %vm243_vm0 = vcmask (!%p410_p10), 7168  }
  0x63   : > { %s223_s30 = sadd.s32 %s408_s27, %s1007_s16  ;;  %v233_v3 = vld [vmem:[%s189_s25 + $0x18] sm:$0xff] (!%p410_p10)  ;;  %v234_v4 = vadd.f32 (!%p410_p10), %v232_v2, %v230_v0 }
  0x64   : > { %s409_s23 = sshll.u32 %s223_s30, 3  ;;  %v235_v5 = vadd.f32 (!%p410_p10), %v233_v3, %v231_v1 }
  0x65   : > { %s929_s20 = scalar_lea.vmem %s972_s2, %s409_s23  ;;  %236 = vst [vmem:[#allocation2] sm:$0xff] (!%p410_p10), %v234_v4 }
  0x66   : > { %237 = vst [vmem:[#allocation2 + $0x8] sm:$0xff] (!%p410_p10), %v235_v5  ;;  %v240_v6 = vadd.f32 (!%p410_p10), %v235_v5, %v234_v4 }
  0x68   : > { %241 = vadd.xlane.f32.xlu0 %v240_v6 }
  0xf5   : > { %v242_v7 = vpop.xlane.xlu0 %241 }
  0xf6   : > { %244 = vst.msk [vmem:[#allocation3] sm:$0xff] %vm243_vm0, %v242_v7 }
  0xf7 PF: > { %v245_v8 = vld [vmem:[%s180_s24] sm:$0xff]  ;;  %v246_v9 = vld [vmem:[%s180_s24 + $0x8] sm:$0xff]  ;;  %vm274_vm1 = vcmask 7168  }
  0xf8   : > { %v247_v10 = vmul.f32 10.0, %v245_v8  ;;  %v248_v11 = vmul.f32 10.0, %v246_v9 }
  0xfa   : > { %v249_v12 = vmax.f32 %v247_v10, %v248_v11 }
  0xfb   : > { %v263_v13 = vld [vmem:[#allocation2] sm:$0xff] }
  0xfc   : > { %250 = vmax.xlane.f32.xlu0 %v249_v12  ;;  %v264_v14 = vld [vmem:[#allocation2 + $0x8] sm:$0xff]  ;;  %v265_v15 = vmul.f32 %v263_v13, %v247_v10 }
  0xfd   : > { %v266_v16 = vmul.f32 %v264_v14, %v248_v11  ;;  %v270_v29 = vld [vmem:[#allocation3] sm:$0xff] }
  0xff   : > { %v267_v17 = vadd.f32 %v266_v16, %v265_v15 }
 0x101   : > { %268 = vadd.xlane.f32.xlu1 %v267_v17 }
 0x189   : > { %v251_v18 = vpop.xlane.xlu0 %250 }
 0x18a   : > { %v252_v19 = vsub.f32 %v247_v10, %v251_v18  ;;  %v253_v20 = vsub.f32 %v248_v11, %v251_v18 }
 0x18c   : > { %v254_v21 = vmul.f32 1.442695, %v252_v19  ;;  %v256_v22 = vmul.f32 1.442695, %v253_v20 }
 0x18e   : > { %517 = vpow2.f32 %v254_v21  ;;  %v269_v31 = vpop.xlane.xlu1 %268 }
 0x18f   : > { %519 = vpow2.f32 %v256_v22 }
 0x198   : > { %v518_v23 = vpop.eup %517 }
 0x199   : > { %v520_v24 = vpop.eup %519 }
 0x19a   : > { %v258_v25 = vadd.f32 %v520_v24, %v518_v23 }
 0x19c   : > { %259 = vadd.xlane.f32.xlu0 %v258_v25 }
 0x229   : > { %v260_v26 = vpop.xlane.xlu0 %259 }
 0x22a   : > { %521 = vlog2.f32 %v260_v26 }
 0x234   : > { %v522_v27 = vpop.eup %521 }
 0x235   : > { %v262_v28 = vmul.f32 0.6931472, %v522_v27 }
 0x237   : > { %v271_v30 = vadd.f32 %v262_v28, %v251_v18 }
 0x239   : > { %v272_v32 = vmul.f32 %v271_v30, %v270_v29 }
 0x23b   : > { %v273_v33 = vsub.f32 %v269_v31, %v272_v32 }
 0x23d   : > { %275 = vst.msk [vmem:[%s929_s20] sm:$0xff] %vm274_vm1, %v273_v33 }
 0x23e PF: > { %s18_s19 = sadd.s32 1, %s677_s19   ;;  %s989_s7 = sld [smem:[#allocation10_spill]] }
 0x23f   : > { %p15_p11 = scmp.ge.s32.totalorder %s18_s19, 10   ;;  %s990_s9 = smov %s641_s10 }
 0x240   : > { %s991_s10 = smov %s645_s11  ;;  %s992_s11 = smov %s795_s4 }
 0x241   : > { %s993_s12 = smov %s653_s13  ;;  %s994_s13 = smov %s657_s14 }
 0x242   : > { %s995_s14 = smov %s798_s5  ;;  %s996_s15 = smov %s669_s17 }
 0x243   : > { %s997_s16 = smov %s673_s18  ;;  %s998_s17 = smov %s1001_s21 }
 0x244   : > { %s999_s18 = smov %s989_s7  ;;  %17 = sbr.rel (!%p15_p11) target bundleno = 9 (0x9), region = 85 }
 0x24b   :  { %303 = vsyncpa [#allocation5], 1 }
 0x24c   :  { %305 = vsyncpa [#allocation5 + $0x1], 1 }
 0x24d   :  { %306 = vsyncpa [#allocation7], 1 }
 0x24e   :  { %308 = vsyncpa [#allocation7 + $0x1], 1 }

</bundles_post_ra>
